<compile_context>
chip_gen: v6e
topology: v6e:2x2x1
jax: 0.10.0
libtpu: 0.0.40
codegen_flags: <defaults>
</compile_context>

<pallas_src>
import jax
import jax.numpy as jnp
import numpy as np
from jax.experimental import pallas as pl
from jax.experimental.pallas import tpu as pltpu


# ---------------------------------------------------------------------------
# Device / tiling helpers
# ---------------------------------------------------------------------------
def _tpu_vmem_bytes():
    """Physical VMEM capacity; conservative fallback if the query fails."""
    try:
        info = pltpu.get_tpu_info()
        cap = getattr(info, "vmem_capacity_bytes", None)
        if cap:
            return int(cap)
    except Exception:
        pass
    return 64 << 20  # v7x per-TensorCore capacity (most restrictive)


def _pick_tile_s(num_tasks, channels, in_bytes, out_bytes, spatial, vmem_cap):
    """Largest spatial tile (multiple of 128, <=2048) fitting a VMEM budget."""
    TC = num_tasks * channels
    budget = int(vmem_cap * 0.6)
    # fixed cost: double-buffered weight block, gram scratch, scale/shift, slack
    fixed = (3 * TC * TC + 8 * TC) * 4 + (1 << 20)
    # per lane-column: double-buffered x in / out blocks + f32 temps (xcat, y)
    per_col = TC * (2 * in_bytes + 2 * out_bytes + 2 * 4)
    max_cols = max(128, (budget - fixed) // max(per_col, 1))
    tile = min(2048, (max_cols // 128) * 128)
    tile = max(128, tile)
    # no point tiling beyond the (padded-up) spatial extent
    tile = min(tile, ((spatial + 127) // 128) * 128)
    return int(tile)


def _split_spatial(n_tiles, batch, tc, target_parallel=8,
                   max_partial_bytes=32 << 20):
    """Split the spatial tile count into (s_outer parallel, s_inner reduction)
    chunks so batch*s_outer gives enough parallel grid work for 2 TensorCores,
    while keeping the partial-stats HBM footprint bounded."""
    per_partial = (tc * tc + tc) * 4
    best = 1
    for d in range(1, n_tiles + 1):
        if n_tiles % d:
            continue
        if batch * d * per_partial > max_partial_bytes:
            break
        best = d
        if batch * d >= target_parallel:
            break
    return best, n_tiles // best


# ---------------------------------------------------------------------------
# Kernel A (pass 1): Gram-matrix batch statistics.
#   grid = (N, s_outer, s_inner); the s_inner axis is the reduction axis.
#   Accumulates G = xcat @ xcat^T and m = sum(xcat, lanes) in VMEM scratch and
#   stores once per (n, s_outer) chunk.
# ---------------------------------------------------------------------------
def make_gram_kernel(num_tasks):
    T = num_tasks

    def gram_kernel(*refs):
        x_refs = refs[:T]
        g_out, m_out = refs[T], refs[T + 1]
        g_acc, m_acc = refs[T + 2], refs[T + 3]

        si = pl.program_id(2)

        @pl.when(si == 0)
        def _():
            g_acc[...] = jnp.zeros_like(g_acc)
            m_acc[...] = jnp.zeros_like(m_acc)

        # One sublane-axis concat per step; each tile is lane-dense (C, tile_s).
        xcat = jnp.concatenate([r[...] for r in x_refs], axis=0)  # (T*C, tile_s)

        # Gram matrix: single long-K MXU matmul, contracts the lane axis of both
        # operands (no materialized transpose).
        g_acc[...] += jax.lax.dot_general(
            xcat, xcat, dimension_numbers=(((1,), (1,)), ((), ())),
            preferred_element_type=jnp.float32)
        # channel sums: XLU lane reduction, overlaps the MXU work above.
        m_acc[...] += jnp.sum(xcat.astype(jnp.float32), axis=1, keepdims=True)

        @pl.when(si == pl.num_programs(2) - 1)
        def _():
            g_out[...] = g_acc[...]
            m_out[...] = m_acc[...]

    return gram_kernel


# ---------------------------------------------------------------------------
# Kernel B (pass 2): fused 1x1 conv + BatchNorm (precomputed scale/shift) + ReLU.
#   One (T*C, T*C) @ (T*C, tile_s) matmul per tile; T lane-dense (C, tile_s)
#   per-task outputs.
# ---------------------------------------------------------------------------
def make_conv_bn_relu_kernel(num_tasks, channels):
    T, C = num_tasks, channels

    def conv_bn_relu_kernel(*refs):
        x_refs = refs[:T]
        w_ref = refs[T]            # (T*C, T*C)
        scale_ref = refs[T + 1]    # (T*C, 1) f32
        shift_ref = refs[T + 2]    # (T*C, 1) f32
        out_refs = refs[T + 3:]    # T refs, each (C, tile_s)

        xcat = jnp.concatenate([r[...] for r in x_refs], axis=0)   # (T*C, tile_s)
        y = jnp.dot(w_ref[...], xcat,
                    preferred_element_type=jnp.float32)            # (T*C, tile_s) f32
        o = jnp.maximum(y * scale_ref[...] + shift_ref[...], 0.0)
        for i in range(T):
            out_refs[i][...] = o[i * C:(i + 1) * C, :].astype(out_refs[i].dtype)

    return conv_bn_relu_kernel


# ---------------------------------------------------------------------------
# Parameter construction (deterministic, per NDDRLayer.__init__)
# ---------------------------------------------------------------------------
def make_nddr_weight(tasks, channels, alpha, beta):
    """Single (T*C, T*C) block matrix; row block i is the conv weight of task i:
    [beta*I ... alpha*I (at block i) ... beta*I]."""
    T = len(tasks)
    eye = np.eye(channels, dtype=np.float32)
    blocks = [[(alpha if t == i else beta) * eye for t in range(T)]
              for i in range(T)]
    return jnp.asarray(np.block(blocks))


# ---------------------------------------------------------------------------
# Forward wrapper
# ---------------------------------------------------------------------------
def nddr_forward(x_dict, weights, tasks, *, eps=1e-5):
    T = len(tasks)
    N, C, H, W = x_dict[tasks[0]].shape
    TC = T * C
    S = H * W
    dtype = x_dict[tasks[0]].dtype
    in_bytes = np.dtype(dtype).itemsize
    out_bytes = in_bytes

    vmem_cap = _tpu_vmem_bytes()
    tile_s = _pick_tile_s(T, C, in_bytes, out_bytes, S, vmem_cap)
    s_pad = int(pl.cdiv(S, tile_s)) * tile_s
    n_tiles = s_pad // tile_s
    s_outer, s_inner = _split_spatial(n_tiles, N, TC)

    # Generation-aware scoped-VMEM limit (budget + margin, below physical).
    per_col = TC * (2 * in_bytes + 2 * out_bytes + 2 * 4)
    fixed = (3 * TC * TC + 8 * TC) * 4 + (1 << 20)
    usage = fixed + per_col * tile_s + (8 << 20)
    vmem_limit = int(min(vmem_cap - (2 << 20), max(32 << 20, usage)))

    # NCHW -> (N, C, H*W) is a metadata reshape; zero-pad spatial to a tile
    # multiple (zeros contribute nothing to G / m; padded outputs sliced off).
    xs = []
    for t in tasks:
        xf = x_dict[t].reshape(N, C, S)
        if s_pad != S:
            xf = jnp.pad(xf, ((0, 0), (0, 0), (0, s_pad - S)))
        xs.append(xf)

    # ---- pass 1: Gram-matrix batch statistics -------------------------------
    x_specs_p1 = [
        pl.BlockSpec((None, C, tile_s),
                     lambda n, so, si, _k=s_inner: (n, 0, so * _k + si))
        for _ in range(T)
    ]
    g_spec = pl.BlockSpec((None, None, TC, TC), lambda n, so, si: (n, so, 0, 0))
    m_spec = pl.BlockSpec((None, None, TC, 1), lambda n, so, si: (n, so, 0, 0))

    ce1 = pl.CostEstimate(
        flops=int(2 * TC * TC * N * s_pad + TC * N * s_pad),
        transcendentals=0,
        bytes_accessed=int(N * T * C * s_pad * in_bytes
                           + N * s_outer * (TC * TC + TC) * 4))

    g_parts, m_parts = pl.pallas_call(
        make_gram_kernel(T),
        out_shape=(
            jax.ShapeDtypeStruct((N, s_outer, TC, TC), jnp.float32),
            jax.ShapeDtypeStruct((N, s_outer, TC, 1), jnp.float32),
        ),
        grid_spec=pltpu.PrefetchScalarGridSpec(
            num_scalar_prefetch=0,
            grid=(N, s_outer, s_inner),
            in_specs=x_specs_p1,
            out_specs=(g_spec, m_spec),
            scratch_shapes=[pltpu.VMEM((TC, TC), jnp.float32),
                            pltpu.VMEM((TC, 1), jnp.float32)]),
        compiler_params=pltpu.CompilerParams(
            dimension_semantics=("parallel", "parallel", "arbitrary"),
            vmem_limit_bytes=vmem_limit),
        cost_estimate=ce1,
    )(*xs)

    # BatchNorm (training mode, biased variance, gamma=1, beta=0):
    #   sum_y = W m ;  sum_y2 = diag(W G W^T)
    # TODO(synk): running_mean/running_var buffer updates (momentum=0.05) are a
    # training-only side effect with no influence on this forward output.
    # TODO(synk): var = E[y^2] - E[y]^2 in f32 can cancel for strongly
    # non-centered activations; a shifted/Welford accumulation would be safer.
    w_f32 = weights.astype(jnp.float32)
    count = float(N * S)                                   # true (unpadded) count
    G = jnp.sum(g_parts, axis=(0, 1))                      # (TC, TC)
    m = jnp.sum(m_parts, axis=(0, 1))                      # (TC, 1)
    sum_y = jnp.dot(w_f32, m)                              # (TC, 1)
    sum_y2 = jnp.sum(jnp.dot(w_f32, G) * w_f32, axis=1, keepdims=True)
    mean = sum_y / count
    var = sum_y2 / count - mean * mean
    scale = jax.lax.rsqrt(var + eps)
    shift = -mean * scale

    # ---- pass 2: fused conv + BN + ReLU, lane-dense per-task outputs --------
    x_specs_p2 = [pl.BlockSpec((None, C, tile_s), lambda n, s: (n, 0, s))
                  for _ in range(T)]
    w_spec = pl.BlockSpec((TC, TC), lambda n, s: (0, 0))
    sc_spec = pl.BlockSpec((TC, 1), lambda n, s: (0, 0))
    out_spec = pl.BlockSpec((None, C, tile_s), lambda n, s: (n, 0, s))

    ce2 = pl.CostEstimate(
        flops=int(2 * TC * TC * N * s_pad + 3 * TC * N * s_pad),
        transcendentals=0,
        bytes_accessed=int(N * T * C * s_pad * (in_bytes + out_bytes)
                           + TC * TC * 4 + 2 * TC * 4))

    outs = pl.pallas_call(
        make_conv_bn_relu_kernel(T, C),
        out_shape=tuple(jax.ShapeDtypeStruct((N, C, s_pad), dtype)
                        for _ in range(T)),
        grid_spec=pltpu.PrefetchScalarGridSpec(
            num_scalar_prefetch=0,
            grid=(N, n_tiles),
            in_specs=x_specs_p2 + [w_spec, sc_spec, sc_spec],
            out_specs=tuple(out_spec for _ in range(T))),
        compiler_params=pltpu.CompilerParams(
            dimension_semantics=("parallel", "parallel"),
            vmem_limit_bytes=vmem_limit),
        cost_estimate=ce2,
    )(*xs, weights.astype(dtype), scale, shift)

    result = {}
    for i, t in enumerate(tasks):
        o = outs[i]
        if s_pad != S:
            o = o[:, :, :S]
        result[t] = o.reshape(N, C, H, W)
    return result


# ---------------------------------------------------------------------------
# Pure-JAX reference (for correctness check)
# ---------------------------------------------------------------------------
def nddr_reference(x_dict, w_full, tasks, eps=1e-5):
    C = x_dict[tasks[0]].shape[1]
    xcat = jnp.concatenate([x_dict[t] for t in tasks], axis=1)   # (N, T*C, H, W)
    y = jnp.einsum('oc,nchw->nohw', w_full, xcat)                # (N, T*C, H, W)
    outs = {}
    for i, t in enumerate(tasks):
        yi = y[:, i * C:(i + 1) * C]
        mean = yi.mean(axis=(0, 2, 3), keepdims=True)
        var = ((yi - mean) ** 2).mean(axis=(0, 2, 3), keepdims=True)  # biased
        outs[t] = jnp.maximum((yi - mean) * jax.lax.rsqrt(var + eps), 0.0)
    return outs


if __name__ == "__main__":
    tasks = ["semseg", "depth"]
    channels = 4
    alpha, beta = 0.9, 0.1
    N, H, W = 2, 16, 16

    key = jax.random.PRNGKey(0)
    keys = jax.random.split(key, len(tasks))
    x = {t: jax.random.normal(k, (N, channels, H, W), dtype=jnp.float32)
         for t, k in zip(tasks, keys)}

    weights = make_nddr_weight(tasks, channels, alpha, beta)

    out = nddr_forward(x, weights, tasks)
    out = jax.tree_util.tree_map(jax.block_until_ready, out)

    ref = nddr_reference(x, weights, tasks)
    for t in tasks:
        np.testing.assert_allclose(np.asarray(out[t]), np.asarray(ref[t]),
                                   rtol=1e-4, atol=1e-4)

    print("KERNEL_OK")
</pallas_src>

<mosaic_0001>
module attributes {stable_mosaic.version = 11 : i64} {
  func.func @gram_kernel(%arg0: i32, %arg1: i32, %arg2: i32, %arg3: memref<1x4x256xf32, #tpu.memory_space<vmem>>, %arg4: memref<1x4x256xf32, #tpu.memory_space<vmem>>, %arg5: memref<1x1x8x8xf32, #tpu.memory_space<vmem>>, %arg6: memref<1x1x8x1xf32, #tpu.memory_space<vmem>>, %arg7: memref<8x8xf32, #tpu.memory_space<vmem>>, %arg8: memref<8x1xf32, #tpu.memory_space<vmem>>) attributes {dimension_semantics = [#tpu.dimension_semantics<parallel>, #tpu.dimension_semantics<parallel>, #tpu.dimension_semantics<arbitrary>], iteration_bounds = array<i64: 2, 1, 1>, scalar_prefetch = 0 : i64, scratch_operands = 2 : i64, tpu.core_type = #tpu.core_type<tc>, window_params = [{transform_indices = @transform_0, window_bounds = array<i64: 1, 4, 256>}, {transform_indices = @transform_1, window_bounds = array<i64: 1, 4, 256>}, {transform_indices = @transform_2, window_bounds = array<i64: 1, 1, 8, 8>}, {transform_indices = @transform_3, window_bounds = array<i64: 1, 1, 8, 1>}]} {
    %c0_i32 = arith.constant 0 : i32
    %0 = arith.cmpi eq, %arg2, %c0_i32 : i32
    %1 = arith.extui %0 : i1 to i32
    %c0_i32_0 = arith.constant 0 : i32
    %2 = arith.cmpi ne, %1, %c0_i32_0 : i32
    scf.if %2 {
      %cst_17 = arith.constant 0.000000e+00 : f32
      %20 = vector.broadcast %cst_17 : f32 to vector<8x8xf32>
      %c0_18 = arith.constant 0 : index
      %c0_19 = arith.constant 0 : index
      %21 = vector.load %arg7[%c0_18, %c0_19] : memref<8x8xf32, #tpu.memory_space<vmem>>, vector<8x8xf32>
      tpu.vector_store %arg7[%c0_18, %c0_19], %20 {strides = array<i32>} : memref<8x8xf32, #tpu.memory_space<vmem>>, vector<8x8xf32>,
      %cst_20 = arith.constant 0.000000e+00 : f32
      %22 = vector.broadcast %cst_20 : f32 to vector<8x1xf32>
      %c0_21 = arith.constant 0 : index
      %c0_22 = arith.constant 0 : index
      %23 = vector.load %arg8[%c0_21, %c0_22] : memref<8x1xf32, #tpu.memory_space<vmem>>, vector<8x1xf32>
      tpu.vector_store %arg8[%c0_21, %c0_22], %22 {strides = array<i32>} : memref<8x1xf32, #tpu.memory_space<vmem>>, vector<8x1xf32>,
    } else {
    }
    %c0 = arith.constant 0 : index
    %c0_1 = arith.constant 0 : index
    %c0_2 = arith.constant 0 : index
    %3 = vector.load %arg3[%c0, %c0_1, %c0_2] : memref<1x4x256xf32, #tpu.memory_space<vmem>>, vector<1x4x256xf32>
    %4 = vector.shape_cast %3 : vector<1x4x256xf32> to vector<4x256xf32>
    %c0_3 = arith.constant 0 : index
    %c0_4 = arith.constant 0 : index
    %c0_5 = arith.constant 0 : index
    %5 = vector.load %arg4[%c0_3, %c0_4, %c0_5] : memref<1x4x256xf32, #tpu.memory_space<vmem>>, vector<1x4x256xf32>
    %6 = vector.shape_cast %5 : vector<1x4x256xf32> to vector<4x256xf32>
    %7 = tpu.concatenate %4, %6 in 0 : vector<4x256xf32>, vector<4x256xf32> -> vector<8x256xf32>
    %c0_6 = arith.constant 0 : index
    %c0_7 = arith.constant 0 : index
    %8 = vector.load %arg7[%c0_6, %c0_7] : memref<8x8xf32, #tpu.memory_space<vmem>>, vector<8x8xf32>
    %cst = arith.constant dense<0.000000e+00> : vector<8x8xf32>
    %9 = tpu.matmul %7, %7, %cst {dimension_numbers = #tpu.dot_dimension_numbers<[1], [1], [0], [0], [0, 0, 1, 0], [], []>} : vector<8x256xf32>, vector<8x256xf32>, vector<8x8xf32> -> vector<8x8xf32>
    %10 = arith.addf %8, %9 : vector<8x8xf32>
    %c0_8 = arith.constant 0 : index
    %c0_9 = arith.constant 0 : index
    %11 = vector.load %arg7[%c0_8, %c0_9] : memref<8x8xf32, #tpu.memory_space<vmem>>, vector<8x8xf32>
    tpu.vector_store %arg7[%c0_8, %c0_9], %10 {strides = array<i32>} : memref<8x8xf32, #tpu.memory_space<vmem>>, vector<8x8xf32>,
    %c0_10 = arith.constant 0 : index
    %c0_11 = arith.constant 0 : index
    %12 = vector.load %arg8[%c0_10, %c0_11] : memref<8x1xf32, #tpu.memory_space<vmem>>, vector<8x1xf32>
    %cst_12 = arith.constant dense<0.000000e+00> : vector<8xf32>
    %13 = vector.multi_reduction <add>, %7, %cst_12 [1] : vector<8x256xf32> to vector<8xf32>
    %14 = vector.shape_cast %13 : vector<8xf32> to vector<8x1xf32>
    %15 = arith.addf %12, %14 : vector<8x1xf32>
    %c0_13 = arith.constant 0 : index
    %c0_14 = arith.constant 0 : index
    %16 = vector.load %arg8[%c0_13, %c0_14] : memref<8x1xf32, #tpu.memory_space<vmem>>, vector<8x1xf32>
    tpu.vector_store %arg8[%c0_13, %c0_14], %15 {strides = array<i32>} : memref<8x1xf32, #tpu.memory_space<vmem>>, vector<8x1xf32>,
    %c0_i32_15 = arith.constant 0 : i32
    %17 = arith.cmpi eq, %arg2, %c0_i32_15 : i32
    %18 = arith.extui %17 : i1 to i32
    %c0_i32_16 = arith.constant 0 : i32
    %19 = arith.cmpi ne, %18, %c0_i32_16 : i32
    scf.if %19 {
      %c0_17 = arith.constant 0 : index
      %c0_18 = arith.constant 0 : index
      %20 = vector.load %arg7[%c0_17, %c0_18] : memref<8x8xf32, #tpu.memory_space<vmem>>, vector<8x8xf32>
      %c0_19 = arith.constant 0 : index
      %c0_20 = arith.constant 0 : index
      %c0_21 = arith.constant 0 : index
      %c0_22 = arith.constant 0 : index
      %21 = vector.load %arg5[%c0_19, %c0_20, %c0_21, %c0_22] : memref<1x1x8x8xf32, #tpu.memory_space<vmem>>, vector<1x1x8x8xf32>
      %22 = vector.shape_cast %21 : vector<1x1x8x8xf32> to vector<8x8xf32>
      %23 = vector.shape_cast %20 : vector<8x8xf32> to vector<1x1x8x8xf32>
      tpu.vector_store %arg5[%c0_19, %c0_20, %c0_21, %c0_22], %23 {strides = array<i32>} : memref<1x1x8x8xf32, #tpu.memory_space<vmem>>, vector<1x1x8x8xf32>,
      %c0_23 = arith.constant 0 : index
      %c0_24 = arith.constant 0 : index
      %24 = vector.load %arg8[%c0_23, %c0_24] : memref<8x1xf32, #tpu.memory_space<vmem>>, vector<8x1xf32>
      %c0_25 = arith.constant 0 : index
      %c0_26 = arith.constant 0 : index
      %c0_27 = arith.constant 0 : index
      %c0_28 = arith.constant 0 : index
      %25 = vector.load %arg6[%c0_25, %c0_26, %c0_27, %c0_28] : memref<1x1x8x1xf32, #tpu.memory_space<vmem>>, vector<1x1x8x1xf32>
      %26 = vector.shape_cast %25 : vector<1x1x8x1xf32> to vector<8x1xf32>
      %27 = vector.shape_cast %24 : vector<8x1xf32> to vector<1x1x8x1xf32>
      tpu.vector_store %arg6[%c0_25, %c0_26, %c0_27, %c0_28], %27 {strides = array<i32>} : memref<1x1x8x1xf32, #tpu.memory_space<vmem>>, vector<1x1x8x1xf32>,
    } else {
    }
    return
  }
  func.func @transform_0(%arg0: i32, %arg1: i32, %arg2: i32) -> (i32, i32, i32) {
    %c1_i32 = arith.constant 1 : i32
    %0 = arith.muli %arg1, %c1_i32 : i32
    %1 = arith.addi %0, %arg2 : i32
    %c0_i32 = arith.constant 0 : i32
    %c0_i32_0 = arith.constant 0 : i32
    return %arg0, %c0_i32, %1 : i32, i32, i32
  }
  func.func @transform_1(%arg0: i32, %arg1: i32, %arg2: i32) -> (i32, i32, i32) {
    %c1_i32 = arith.constant 1 : i32
    %0 = arith.muli %arg1, %c1_i32 : i32
    %1 = arith.addi %0, %arg2 : i32
    %c0_i32 = arith.constant 0 : i32
    %c0_i32_0 = arith.constant 0 : i32
    return %arg0, %c0_i32, %1 : i32, i32, i32
  }
  func.func @transform_2(%arg0: i32, %arg1: i32, %arg2: i32) -> (i32, i32, i32, i32) {
    %c0_i32 = arith.constant 0 : i32
    %c0_i32_0 = arith.constant 0 : i32
    %c0_i32_1 = arith.constant 0 : i32
    return %arg0, %arg1, %c0_i32, %c0_i32_0 : i32, i32, i32, i32
  }
  func.func @transform_3(%arg0: i32, %arg1: i32, %arg2: i32) -> (i32, i32, i32, i32) {
    %c0_i32 = arith.constant 0 : i32
    %c0_i32_0 = arith.constant 0 : i32
    %c0_i32_1 = arith.constant 0 : i32
    return %arg0, %arg1, %c0_i32, %c0_i32_0 : i32, i32, i32, i32
  }
}

</mosaic_0001>

<bundles_post_ra>
// kernel: tpu_custom_call.1
= control target key start
LH: loop header
LB: loop body
LE: loop exit
PB: predicated region body
PF: predicated region fallthrough
CT: control target
= control target key end

     0   :  { %9 = vsyncpa [#allocation5], 0  ;;  %s996_s0 = inlined_call_operand.hbm [shape: f32[2,4,256], index: 0, kind: input, shape index: {}]   ;;  %s997_s1 = inlined_call_operand.hbm [shape: f32[2,4,256], index: 1, kind: input, shape index: {}]   ;;  %s998_s2 = inlined_call_operand.hbm [shape: f32[2,1,8,8], index: 2, kind: output, shape index: {0}]   ;;  %s999_s3 = inlined_call_operand.vmem [shape: f32[2,1,8,1], index: 3, kind: output, shape index: {1}]  }
   0x1   :  { %11 = vsyncpa [#allocation5 + $0x1], 0 }
   0x2   :  { %12 = vsyncpa [#allocation8], 0 }
   0x3   :  { %14 = vsyncpa [#allocation8 + $0x1], 0 }
   0x4   :  { %15 = vsyncpa [#allocation6], 0 }
   0x5   :  { %17 = vsyncpa [#allocation6 + $0x1], 0  ;;  %s816_s12 = smov 0   ;;  %s818_s13 = smov 0  }
   0x6   :  { %s820_s14 = smov 0   ;;  %s822_s15 = smov 0  }
   0x7   :  { %s824_s16 = smov 0   ;;  %s826_s17 = smov 0  }
   0x8 LB: > { %s559_s18 = sadd.s32 4294967295, %s790_s17   ;;  %s560_s19 = sadd.s32 4294967294, %s790_s17   ;;  %s790_s17 = sphi %s826_s17, %s23_s17   ;;  %s786_s16 = sphi %s824_s16, %s1011_s16   ;;  %s782_s15 = sphi %s822_s15, %s1010_s15   ;;  %s778_s14 = sphi %s820_s14, %s1009_s14   ;;  %s774_s13 = sphi %s818_s13, %s1008_s13   ;;  %s770_s12 = sphi %s816_s12, %s1007_s12  }
   0x9   : > { %s42_s20 = sadd.s32 1, %s786_s16  ;;  %s53_s21 = sadd.s32 1, %s778_s14 }
   0xa   : > { %p44_p0 = scmp.ge.s32.totalorder %s42_s20, 2  ;;  %p60_p1 = scmp.ne.s32.totalorder %s778_s14, %s774_s13 }
   0xb   : > { %p61_p2 = scmp.eq.s32.totalorder %s790_s17, 0  ;;  %p66_p3 = scmp.ne.s32.totalorder %s774_s13, %s770_s12 }
   0xc   : > { %s1013_s20 = smov (%p44_p0, %s42_s20), 0  ;;  %p67_p5 = scmp.eq.s32.totalorder %s559_s18, 0 }
   0xd   : > { %p857_p4 = por %p61_p2, %p60_p1  ;;  %s48_s23 = ssub.s32 %s786_s16, %s1013_s20 }
   0xe   : > { %p122_p6 = scmp.eq.s32.totalorder %s559_s18, 1  ;;  %p51_p7 = scmp.eq.s32.totalorder %s48_s23, 0 }
   0xf   : > { %p863_p8 = por %p67_p5, %p66_p3  ;;  %p128_p10 = scmp.eq.s32.totalorder %s560_s19, 1 }
  0x10   : > { %p867_p9 = por %p122_p6, %p60_p1  ;;  %p597_p13 = scmp.lt.s32.totalorder %s790_s17, 2 }
  0x11   : > { %s872_s26 = scalar_select %p51_p7, %s778_s14, %s53_s21  }
  0x12   : > { %p874_p11 = por %p128_p10, %p66_p3  ;;  %s881_s28 = sand.u32 1, %s778_s14  }
  0x13   : > { %s563_s29 = sshll.u32 %s881_s28, 3  ;;  %s578_s30 = sshll.u32 %s786_s16, 7 }
  0x14   : > { %s189_s6 = scalar_lea.hbm %s996_s0, %s578_s30  ;;  %s180_s7 = scalar_lea.vmem [#allocation4], %s563_s29 }
  0x15   : > { %s191_s8 = sshll.u32 %s180_s7, 4  ;;  %p890_p0 = pnand %p597_p13, %p857_p4  ;;  %s192_s8 = int_to_ptr.vmem [resolvable:$true] %s191_s8 }
  0x16   : > { %p569_p1 = scmp.ge.s32.totalorder %s790_s17, 1  ;;  %p218_p2 = scmp.lt.s32.totalorder %s790_s17, 3 }
  0x17   : > { %s177_s10 = scalar_lea.sflag [#allocation5], %s881_s28  ;;  %p652_p3 = pneg %p890_p0 }
  0x18   : > { %s663_s11 = scalar_lea.vmem %s192_s8, 128  ;;  %s792_s18 = smov [#allocation4]  }
  0x19   : > { %p664_p5 = scmp.ne.s32.totalorder %s192_s8, %s663_s11  ;;  %s668_s19 = sshll.u32 %s792_s18, 4  ;;  %s669_s19 = int_to_ptr.vmem [resolvable:$false] %s668_s19 }
  0x1a   : > { %s670_s21 = scalar_lea.vmem %s669_s19, 256  ;;  %p671_p4 = scmp.lt.s32.totalorder %s192_s8, %s669_s19 }
  0x1b   : > { %p666_p6 = pnand %p664_p5, %p652_p3  ;;  %p672_p10 = scmp.lt.s32.totalorder %s670_s21, %s663_s11 }
  0x1d   : > { %p667_p7 = pneg %p666_p6  ;;  %p673_p13 = por %p672_p10, %p671_p4 }
  0x1f   : > { %p674_p12 = pnand %p673_p13, %p667_p7 }
  0x21   : > { %677 = shalt.err (!%p674_p12)
}
  0x22   : > { %589 = dma.hbm_to_vmem [thread:$0]  (!%p890_p0), %s189_s6, 128, %s192_s8, %s177_s10  }
  0x23   : > { %p908_p5 = pnand %p569_p1, %p218_p2  ;;  %s211_s5 = scalar_lea.hbm %s997_s1, %s578_s30 }
  0x24   : > { %s202_s7 = scalar_lea.vmem [#allocation7], %s563_s29  ;;  %s199_s18 = scalar_lea.sflag [#allocation8], %s881_s28 }
  0x25   : > { %s213_s11 = sshll.u32 %s202_s7, 4  ;;  %s793_s6 = smov [#allocation7]   ;;  %s214_s11 = int_to_ptr.vmem [resolvable:$true] %s213_s11 }
  0x26   : > { %s691_s19 = scalar_lea.vmem %s214_s11, 128  ;;  %s696_s8 = sshll.u32 %s793_s6, 4  ;;  %s697_s8 = int_to_ptr.vmem [resolvable:$false] %s696_s8 }
  0x27   : > { %p692_p12 = scmp.ne.s32.totalorder %s214_s11, %s691_s19  ;;  %s698_s10 = scalar_lea.vmem %s697_s8, 256 }
  0x28   : > { %p699_p1 = scmp.lt.s32.totalorder %s214_s11, %s697_s8  ;;  %p700_p2 = scmp.lt.s32.totalorder %s698_s10, %s691_s19 }
  0x29   : > { %p694_p6 = pnand %p692_p12, %p652_p3 }
  0x2a   : > { %p701_p4 = por %p700_p2, %p699_p1 }
  0x2b   : > { %p695_p7 = pneg %p694_p6 }
  0x2d   : > { %p702_p10 = pnand %p701_p4, %p695_p7 }
  0x2f   : > { %705 = shalt.err (!%p702_p10)
}
  0x30   : > { %592 = dma.hbm_to_vmem [thread:$0]  (!%p890_p0), %s211_s5, 128, %s214_s11, %s199_s18  }
  0x31   : > { %222 = sbr.rel (%p908_p5) target bundleno = 281 (0x119), region = 28  ;;  %s924_s28 = sand.u32 (!%p908_p5), 1, %s774_s13  }
  0x32   : > { %s927_s29 = sshll.u32 (!%p908_p5), %s924_s28, 3  ;;  %s225_s30 = scalar_lea.sflag (!%p908_p5), [#allocation5], %s924_s28 }
  0x33   : > { %s228_s21 = scalar_lea.vmem (!%p908_p5), [#allocation4], %s927_s29 }
  0x36   : > { %757 = dma.done.wait (%p863_p8), %s225_s30, 128  }
  0x37   : > { %759 = vsyncadd (%p863_p8), %s225_s30, 4294967168  ;;  %s234_s9 = scalar_lea.sflag [#allocation8], %s924_s28  ;;  %s237_s22 = scalar_lea.vmem [#allocation7], %s927_s29 }
  0x38   : > { %761 = dma.done.wait (%p863_p8), %s234_s9, 128  }
  0x39   : > { %763 = vsyncadd (%p863_p8), %s234_s9, 4294967168  ;;  %vm287_vm0 = vcmask 64512   ;;  %v794_v0 = vmov 0.0   ;;  %v291_v1 = vld [vmem:[%s228_s21] sm:$0xff]  ;;  %v292_v2 = vld [vmem:[%s237_s22] sm:$0xff]  ;;  %vm299_vm1 = vcmask 1043456  }
  0x3a   : > { %288 = vst.msk [vmem:[#allocation2] sm:$0xff] %vm287_vm0, %v794_v0  ;;  %v294_v3 = vcombine.high %v291_v1, %v291_v1  ;;  %v297_v4 = vcombine.low %v292_v2, %v292_v2  ;;  %vm289_vm2 = vcmask 7168   ;;  %p276_p8 = scmp.lt.s32.totalorder %s782_s15, 1  ;;  %s575_s11 = sshll.u32 %s782_s15, 7 }
  0x3b   : > { %290 = vst.msk [vmem:[#allocation3] sm:$0xff] %vm289_vm2, %v794_v0  ;;  %s262_s18 = scalar_lea.vmem [#allocation9], %s927_s29  ;;  %s953_s10 = scalar_lea.hbm %s998_s2, %s575_s11 }
  0x3c   : > { %v301_v5 = vsel %vm299_vm1, %v294_v3, %v292_v2  ;;  %v300_v6 = vsel %vm299_vm1, %v291_v1, %v297_v4  ;;  %s277_s24 = scalar_select %p276_p8, %s782_s15, 1 }
  0x3d   : > { %333 = vmatprep.subr.mxu0 %v301_v5  ;;  %367 = vmatprep.mubr.f32.mxu0 %v301_v5  ;;  %v377_v7 = vadd.f32 %v301_v5, %v300_v6  ;;  %s412_s19 = sshll.u32 %s262_s18, 4  ;;  %s391_s30 = scalar_lea.sflag [#allocation6], %s924_s28  ;;  %s413_s19 = int_to_ptr.vmem [resolvable:$true] %s412_s19 }
  0x3e   : > { %334 = vmatpush1.xpose.msra.mxu0 %v300_v6  ;;  %s573_s23 = sshll.u32 %s277_s24, 3  ;;  %s706_s21 = scalar_lea.vmem %s413_s19, 128 }
  0x3f   : > { %378 = vadd.xlane.f32.xlu0 %v377_v7  ;;  %s282_s7 = scalar_lea.vmem %s999_s3, %s573_s23  ;;  %p707_p0 = scmp.ne.s32.totalorder %s413_s19, %s706_s21 }
  0x40   : > { %s795_s9 = smov [#allocation9]  }
  0x41   : > { %368 = vmatmul.mubr.f32.vlgmr.msra.gmra.mxu0 %v300_v6  ;;  %v302_v12 = vld [vmem:[#allocation2] sm:$0xff]  ;;  %p708_p3 = pnand %p707_p0, %p867_p9  ;;  %s710_s22 = sshll.u32 %s795_s9, 4  ;;  %s711_s22 = int_to_ptr.vmem [resolvable:$false] %s710_s22 }
  0x42   : > { %v376_v8 = vld [vmem:[#allocation3] sm:$0xff]  ;;  %s712_s15 = scalar_lea.vmem %s711_s22, 256  ;;  %p713_p5 = scmp.lt.s32.totalorder %s413_s19, %s711_s22 }
  0x43   : > { %p709_p13 = pneg %p708_p3  ;;  %p714_p12 = scmp.lt.s32.totalorder %s712_s15, %s706_s21 }
  0x45   : > { %p715_p6 = por %p714_p12, %p713_p5 }
  0x47   : > { %p716_p7 = pnand %p715_p6, %p709_p13 }
  0xc8   : > { %v379_v9 = vpop.xlane.xlu0 %378 }
  0xc9   : > { %v380_v10 = vadd.f32 %v379_v9, %v376_v8 }
  0xcb   : > { %382 = vst.msk [vmem:[#allocation3] sm:$0xff] %vm289_vm2, %v380_v10 }
  0xd2   : > { %v388_v11 = vld [vmem:[#allocation3] sm:$0xff] }
  0xd3   : > { %389 = vst.msk [vmem:[%s282_s7] sm:$0xff] %vm289_vm2, %v388_v11 }
 0x101   : > { %v369_v13 = vpop.f32.mrf.mxu0 }
 0x102   : > { %v373_v14 = vadd.f32 %v369_v13, %v302_v12 }
 0x103   : > { %v371_v15 = vpop.f32.mrf.mxu0 }
 0x104   : > { %375 = vst.msk [vmem:[#allocation2] sm:$0xff] %vm287_vm0, %v373_v14 }
 0x10b   : > { %v386_v16 = vld [vmem:[#allocation2] sm:$0xff] }
 0x10c   : > { %387 = vst.msk [vmem:[%s262_s18] sm:$0xff] %vm287_vm0, %v386_v16 }
 0x10d   : > { %719 = shalt.err (!%p716_p7)
}
 0x10e   : > { %s720_s29 = scalar_lea.hbm %s953_s10, 128  ;;  %s724_s23 = scalar_lea.hbm %s998_s2, 256 }
 0x10f   : > { %p721_p1 = scmp.ne.s32.totalorder %s953_s10, %s720_s29  ;;  %p725_p10 = scmp.lt.s32.totalorder %s953_s10, %s998_s2 }
 0x110   : > { %p726_p8 = scmp.lt.s32.totalorder %s724_s23, %s720_s29 }
 0x111   : > { %p722_p2 = pnand %p721_p1, %p867_p9 }
 0x112   : > { %p727_p0 = por %p726_p8, %p725_p10 }
 0x113   : > { %p723_p4 = pneg %p722_p2 }
 0x115   : > { %p728_p3 = pnand %p727_p0, %p723_p4 }
 0x117   : > { %731 = shalt.err (!%p728_p3)
}
 0x118   : > { %584 = dma.vmem_to_hbm [thread:$0]  (%p867_p9), %s413_s19, 128, %s953_s10, %s391_s30  }
 0x119 PF: > { %s427_s7 = sand.u32 1, %s770_s12   ;;  %p1006_p13 = scmp.ge.s32.totalorder %s790_s17, 2 }
 0x11a   : > { %s428_s11 = scalar_lea.sflag [#allocation6], %s427_s7 }
 0x11b   : > { %p594_p5 = pnand %p1006_p13, %p874_p11 }
 0x11d   : > { %p595_p12 = pneg %p594_p5 }
 0x11f   : > { %765 = dma.done.wait (%p595_p12), %s428_s11, 128  }
 0x120   : > { %767 = vsyncadd (%p595_p12), %s428_s11, 4294967168  ;;  %s23_s17 = sadd.s32 1, %s790_s17   ;;  %s1007_s12 = smov %s774_s13 }
 0x121   : > { %p20_p6 = scmp.ge.s32.totalorder %s23_s17, 4   ;;  %s1008_s13 = smov %s778_s14 }
 0x122   : > { %s1009_s14 = smov %s872_s26  ;;  %s1010_s15 = smov %s786_s16 }
 0x123   : > { %s1011_s16 = smov %s1013_s20  ;;  %22 = sbr.rel (!%p20_p6) target bundleno = 8 (0x8), region = 106 }
 0x128   :  { %443 = vsyncpa [#allocation5], 1 }
 0x129   :  { %445 = vsyncpa [#allocation5 + $0x1], 1 }
 0x12a   :  { %446 = vsyncpa [#allocation8], 1 }
 0x12b   :  { %448 = vsyncpa [#allocation8 + $0x1], 1 }
 0x12c   :  { %449 = vsyncpa [#allocation6], 1 }
 0x12d   :  { %451 = vsyncpa [#allocation6 + $0x1], 1 }

</bundles_post_ra>
